<compile_context>
chip_gen: v7x
topology: tpu7x:2x2x1
jax: 0.10.0
libtpu: 0.0.40
codegen_flags: <defaults>
</compile_context>

<pallas_src>
import jax
import jax.numpy as jnp
from jax.experimental import pallas as pl
from jax.experimental.pallas import tpu as pltpu

LANE = 128  # TPU lane width; fc3 output padded to this for lane-dense stores.


def mlp_kernel(x_ref, w1_ref, b1_ref, w2_ref, b2_ref, w3_ref, b3_ref, o_ref):
    # bf16 operands for the MXU, f32 accumulation everywhere.
    x = x_ref[...].astype(jnp.bfloat16)

    # fc1 + ReLU (bias/ReLU in f32)
    h = jnp.dot(x, w1_ref[...], preferred_element_type=jnp.float32)
    h = jnp.maximum(h + b1_ref[...], 0.0)

    # fc2 + ReLU
    h = jnp.dot(h.astype(jnp.bfloat16), w2_ref[...],
                preferred_element_type=jnp.float32)
    h = jnp.maximum(h + b2_ref[...], 0.0)

    # fc3 (w3/b3 are zero-padded to LANE columns -> unmasked (TB, 128) store)
    out = jnp.dot(h.astype(jnp.bfloat16), w3_ref[...],
                  preferred_element_type=jnp.float32)
    o_ref[...] = (out + b3_ref[...]).astype(o_ref.dtype)


def mlp_forward(x, w1, b1, w2, b2, w3, b3, *, block_batch=128):
    batch, in_dim = x.shape
    hidden = w1.shape[1]
    out_dim = w3.shape[1]
    assert out_dim <= LANE

    # ---- host-side layout prep (cheap, one-time) -------------------------
    # Weights in bf16 (halves HBM traffic; f32 accumulation in-kernel).
    w1b = w1.astype(jnp.bfloat16)
    w2b = w2.astype(jnp.bfloat16)
    # Pad fc3 to LANE output columns so kernel stores are lane-dense.
    w3b = jnp.pad(w3, ((0, 0), (0, LANE - out_dim))).astype(jnp.bfloat16)
    b3p = jnp.pad(b3, ((0, 0), (0, LANE - out_dim)))

    # Batch tile: multiple of 8 (f32 sublane); pad batch up to a full tile.
    tb = block_batch if batch >= block_batch else (-(-batch // 8) * 8)
    n_tiles = pl.cdiv(batch, tb)
    padded_batch = n_tiles * tb
    if padded_batch != batch:
        x = jnp.pad(x, ((0, padded_batch - batch), (0, 0)))

    flops = 2 * padded_batch * (in_dim * hidden + hidden * hidden + hidden * LANE)
    bytes_accessed = (
        x.size * 4 + w1b.size * 2 + w2b.size * 2 + w3b.size * 2
        + b1.size * 4 + b2.size * 4 + b3p.size * 4
        + padded_batch * LANE * 4
    )

    # NOTE: hidden=64 / in=9 leave the MXU contraction and lanes under-filled;
    # that is fixed by the model architecture, not the kernel.
    const2d = lambda i: (0, 0)  # weights/biases: VMEM-resident across steps
    out_padded = pl.pallas_call(
        mlp_kernel,
        out_shape=jax.ShapeDtypeStruct((padded_batch, LANE), jnp.float32),
        grid=(n_tiles,),
        in_specs=[
            pl.BlockSpec((tb, in_dim), lambda i: (i, 0)),        # x tile
            pl.BlockSpec(w1b.shape, const2d),
            pl.BlockSpec(b1.shape, const2d),
            pl.BlockSpec(w2b.shape, const2d),
            pl.BlockSpec(b2.shape, const2d),
            pl.BlockSpec(w3b.shape, const2d),
            pl.BlockSpec(b3p.shape, const2d),
        ],
        out_specs=pl.BlockSpec((tb, LANE), lambda i: (i, 0)),
        compiler_params=pltpu.CompilerParams(
            dimension_semantics=("parallel",)),
        cost_estimate=pl.CostEstimate(
            flops=flops, transcendentals=0, bytes_accessed=bytes_accessed),
    )(x, w1b, b1, w2b, b2, w3b, b3p)

    return out_padded[:batch, :out_dim]


def init_params(key, input_size=9, hidden=64, output_size=2):
    # Deterministic init mimicking PyTorch nn.Linear default:
    # U(-1/sqrt(fan_in), 1/sqrt(fan_in)) for both weight and bias.
    ks = jax.random.split(key, 6)

    def linear(kw, kb, fan_in, fan_out):
        bound = 1.0 / jnp.sqrt(fan_in)
        w = jax.random.uniform(kw, (fan_in, fan_out), jnp.float32, -bound, bound)
        b = jax.random.uniform(kb, (1, fan_out), jnp.float32, -bound, bound)
        return w, b

    w1, b1 = linear(ks[0], ks[1], input_size, hidden)
    w2, b2 = linear(ks[2], ks[3], hidden, hidden)
    w3, b3 = linear(ks[4], ks[5], hidden, output_size)
    return w1, b1, w2, b2, w3, b3


if __name__ == "__main__":
    key = jax.random.PRNGKey(0)
    k_x, k_p = jax.random.split(key)

    batch, input_size, hidden, output_size = 256, 9, 64, 2
    x = jax.random.normal(k_x, (batch, input_size), jnp.float32)
    w1, b1, w2, b2, w3, b3 = init_params(k_p, input_size, hidden, output_size)

    out = mlp_forward(x, w1, b1, w2, b2, w3, b3, block_batch=128)
    out = jax.block_until_ready(out)

    # Pure-JAX f32 reference (same semantics as the PyTorch module).
    ref = jnp.maximum(x @ w1 + b1, 0.0)
    ref = jnp.maximum(ref @ w2 + b2, 0.0)
    ref = ref @ w3 + b3

    assert out.shape == (batch, output_size)
    # Tolerance accounts for bf16 MXU operands (f32 accumulation).
    assert jnp.allclose(out, ref, atol=3e-2, rtol=3e-2), float(
        jnp.max(jnp.abs(out - ref)))

    print("KERNEL_OK")
</pallas_src>

<mosaic_0001>
module attributes {stable_mosaic.version = 11 : i64} {
  func.func @mlp_kernel(%arg0: i32, %arg1: memref<128x9xf32, #tpu.memory_space<vmem>>, %arg2: memref<9x64xbf16, #tpu.memory_space<vmem>>, %arg3: memref<1x64xf32, #tpu.memory_space<vmem>>, %arg4: memref<64x64xbf16, #tpu.memory_space<vmem>>, %arg5: memref<1x64xf32, #tpu.memory_space<vmem>>, %arg6: memref<64x128xbf16, #tpu.memory_space<vmem>>, %arg7: memref<1x128xf32, #tpu.memory_space<vmem>>, %arg8: memref<128x128xf32, #tpu.memory_space<vmem>>) attributes {dimension_semantics = [#tpu.dimension_semantics<parallel>], iteration_bounds = array<i64: 2>, scalar_prefetch = 0 : i64, scratch_operands = 0 : i64, tpu.core_type = #tpu.core_type<tc>, window_params = [{transform_indices = @transform_0, window_bounds = array<i64: 128, 9>}, {pipeline_mode = #tpu.pipeline_mode<synchronous>, transform_indices = @transform_1, window_bounds = array<i64: 9, 64>}, {pipeline_mode = #tpu.pipeline_mode<synchronous>, transform_indices = @transform_2, window_bounds = array<i64: 1, 64>}, {pipeline_mode = #tpu.pipeline_mode<synchronous>, transform_indices = @transform_3, window_bounds = array<i64: 64, 64>}, {pipeline_mode = #tpu.pipeline_mode<synchronous>, transform_indices = @transform_4, window_bounds = array<i64: 1, 64>}, {pipeline_mode = #tpu.pipeline_mode<synchronous>, transform_indices = @transform_5, window_bounds = array<i64: 64, 128>}, {pipeline_mode = #tpu.pipeline_mode<synchronous>, transform_indices = @transform_6, window_bounds = array<i64: 1, 128>}, {transform_indices = @transform_7, window_bounds = array<i64: 128, 128>}]} {
    %c0 = arith.constant 0 : index
    %c0_0 = arith.constant 0 : index
    %0 = vector.load %arg1[%c0, %c0_0] : memref<128x9xf32, #tpu.memory_space<vmem>>, vector<128x9xf32>
    %1 = arith.truncf %0 : vector<128x9xf32> to vector<128x9xbf16>
    %c0_1 = arith.constant 0 : index
    %c0_2 = arith.constant 0 : index
    %2 = vector.load %arg2[%c0_1, %c0_2] : memref<9x64xbf16, #tpu.memory_space<vmem>>, vector<9x64xbf16>
    %cst = arith.constant dense<0.000000e+00> : vector<128x64xf32>
    %3 = tpu.matmul %1, %2, %cst {dimension_numbers = #tpu.dot_dimension_numbers<[1], [0], [0], [1], [0, 0, 1, 1], [], []>} : vector<128x9xbf16>, vector<9x64xbf16>, vector<128x64xf32> -> vector<128x64xf32>
    %c0_3 = arith.constant 0 : index
    %c0_4 = arith.constant 0 : index
    %4 = vector.load %arg3[%c0_3, %c0_4] : memref<1x64xf32, #tpu.memory_space<vmem>>, vector<1x64xf32>
    %5 = vector.broadcast %4 : vector<1x64xf32> to vector<128x64xf32>
    %6 = arith.addf %3, %5 : vector<128x64xf32>
    %cst_5 = arith.constant 0.000000e+00 : f32
    %7 = vector.broadcast %cst_5 : f32 to vector<128x64xf32>
    %8 = arith.maximumf %6, %7 : vector<128x64xf32>
    %9 = arith.truncf %8 : vector<128x64xf32> to vector<128x64xbf16>
    %c0_6 = arith.constant 0 : index
    %c0_7 = arith.constant 0 : index
    %10 = vector.load %arg4[%c0_6, %c0_7] : memref<64x64xbf16, #tpu.memory_space<vmem>>, vector<64x64xbf16>
    %cst_8 = arith.constant dense<0.000000e+00> : vector<128x64xf32>
    %11 = tpu.matmul %9, %10, %cst_8 {dimension_numbers = #tpu.dot_dimension_numbers<[1], [0], [0], [1], [0, 0, 1, 1], [], []>} : vector<128x64xbf16>, vector<64x64xbf16>, vector<128x64xf32> -> vector<128x64xf32>
    %c0_9 = arith.constant 0 : index
    %c0_10 = arith.constant 0 : index
    %12 = vector.load %arg5[%c0_9, %c0_10] : memref<1x64xf32, #tpu.memory_space<vmem>>, vector<1x64xf32>
    %13 = vector.broadcast %12 : vector<1x64xf32> to vector<128x64xf32>
    %14 = arith.addf %11, %13 : vector<128x64xf32>
    %cst_11 = arith.constant 0.000000e+00 : f32
    %15 = vector.broadcast %cst_11 : f32 to vector<128x64xf32>
    %16 = arith.maximumf %14, %15 : vector<128x64xf32>
    %17 = arith.truncf %16 : vector<128x64xf32> to vector<128x64xbf16>
    %c0_12 = arith.constant 0 : index
    %c0_13 = arith.constant 0 : index
    %18 = vector.load %arg6[%c0_12, %c0_13] : memref<64x128xbf16, #tpu.memory_space<vmem>>, vector<64x128xbf16>
    %cst_14 = arith.constant dense<0.000000e+00> : vector<128x128xf32>
    %19 = tpu.matmul %17, %18, %cst_14 {dimension_numbers = #tpu.dot_dimension_numbers<[1], [0], [0], [1], [0, 0, 1, 1], [], []>} : vector<128x64xbf16>, vector<64x128xbf16>, vector<128x128xf32> -> vector<128x128xf32>
    %c0_15 = arith.constant 0 : index
    %c0_16 = arith.constant 0 : index
    %20 = vector.load %arg7[%c0_15, %c0_16] : memref<1x128xf32, #tpu.memory_space<vmem>>, vector<1x128xf32>
    %21 = vector.broadcast %20 : vector<1x128xf32> to vector<128x128xf32>
    %22 = arith.addf %19, %21 : vector<128x128xf32>
    %c0_17 = arith.constant 0 : index
    %c0_18 = arith.constant 0 : index
    %23 = vector.load %arg8[%c0_17, %c0_18] : memref<128x128xf32, #tpu.memory_space<vmem>>, vector<128x128xf32>
    tpu.vector_store %arg8[%c0_17, %c0_18], %22 {strides = array<i32>} : memref<128x128xf32, #tpu.memory_space<vmem>>, vector<128x128xf32>,
    return
  }
  func.func @transform_0(%arg0: i32) -> (i32, i32) {
    %c0_i32 = arith.constant 0 : i32
    %c0_i32_0 = arith.constant 0 : i32
    return %arg0, %c0_i32 : i32, i32
  }
  func.func @transform_1(%arg0: i32) -> (i32, i32) {
    %c0_i32 = arith.constant 0 : i32
    %c0_i32_0 = arith.constant 0 : i32
    %c0_i32_1 = arith.constant 0 : i32
    return %c0_i32, %c0_i32_0 : i32, i32
  }
  func.func @transform_2(%arg0: i32) -> (i32, i32) {
    %c0_i32 = arith.constant 0 : i32
    %c0_i32_0 = arith.constant 0 : i32
    %c0_i32_1 = arith.constant 0 : i32
    return %c0_i32, %c0_i32_0 : i32, i32
  }
  func.func @transform_3(%arg0: i32) -> (i32, i32) {
    %c0_i32 = arith.constant 0 : i32
    %c0_i32_0 = arith.constant 0 : i32
    %c0_i32_1 = arith.constant 0 : i32
    return %c0_i32, %c0_i32_0 : i32, i32
  }
  func.func @transform_4(%arg0: i32) -> (i32, i32) {
    %c0_i32 = arith.constant 0 : i32
    %c0_i32_0 = arith.constant 0 : i32
    %c0_i32_1 = arith.constant 0 : i32
    return %c0_i32, %c0_i32_0 : i32, i32
  }
  func.func @transform_5(%arg0: i32) -> (i32, i32) {
    %c0_i32 = arith.constant 0 : i32
    %c0_i32_0 = arith.constant 0 : i32
    %c0_i32_1 = arith.constant 0 : i32
    return %c0_i32, %c0_i32_0 : i32, i32
  }
  func.func @transform_6(%arg0: i32) -> (i32, i32) {
    %c0_i32 = arith.constant 0 : i32
    %c0_i32_0 = arith.constant 0 : i32
    %c0_i32_1 = arith.constant 0 : i32
    return %c0_i32, %c0_i32_0 : i32, i32
  }
  func.func @transform_7(%arg0: i32) -> (i32, i32) {
    %c0_i32 = arith.constant 0 : i32
    %c0_i32_0 = arith.constant 0 : i32
    return %arg0, %c0_i32 : i32, i32
  }
}

</mosaic_0001>

<bundles_post_ra>
// kernel: tpu_custom_call.1
= control target key start
LH: loop header
LB: loop body
LE: loop exit
PB: predicated region body
PF: predicated region fallthrough
CT: control target
= control target key end

     0   :  { %12 = vsyncpa [#allocation3], 0  ;;  %s1421_s0 = inlined_call_operand.vmem [shape: f32[256,9], index: 0, kind: input, shape index: {}]   ;;  %s1422_s1 = inlined_call_operand.vmem [shape: bf16[9,64], index: 1, kind: input, shape index: {}]   ;;  %s1423_s2 = inlined_call_operand.vmem [shape: f32[1,64], index: 2, kind: input, shape index: {}]   ;;  %s1424_s3 = inlined_call_operand.vmem [shape: bf16[64,64], index: 3, kind: input, shape index: {}]   ;;  %s1425_s4 = inlined_call_operand.vmem [shape: f32[1,64], index: 4, kind: input, shape index: {}]   ;;  %s1426_s5 = inlined_call_operand.vmem [shape: bf16[64,128], index: 5, kind: input, shape index: {}]   ;;  %s1427_s6 = inlined_call_operand.vmem [shape: f32[1,128], index: 6, kind: input, shape index: {}]   ;;  %s1428_s7 = inlined_call_operand.hbm [shape: f32[256,128], index: 7, kind: output, shape index: {}]  }
   0x1   :  { %14 = vsyncpa [#allocation3 + $0x1], 0  ;;  %s1218_s24 = smov 0   ;;  %s1220_s25 = smov 0  }
   0x2   :  { %s1222_s26 = smov 0   ;;  %s1224_s27 = smov 0  }
   0x3 LB: > { %s1239_s28 = sadd.s32 4294967295, %s1172_s27   ;;  %s909_s29 = sadd.s32 4294967294, %s1172_s27   ;;  %s1172_s27 = sphi %s1224_s27, %s1434_s27   ;;  %s1168_s26 = sphi %s1222_s26, %s1433_s26   ;;  %s1164_s25 = sphi %s1220_s25, %s1432_s25   ;;  %s1160_s24 = sphi %s1218_s24, %s1431_s24  }
   0x4   : > { %s1243_s30 = sadd.s32 1, %s1172_s27   ;;  %s179_s8 = sadd.s32 1, %s1168_s26 }
   0x5   : > { %s176_s9 = ssub.s32 %s1172_s27, %s1243_s30  ;;  %p189_p0 = scmp.ne.s32.totalorder %s1168_s26, %s1164_s25 }
   0x6   : > { %p177_p1 = scmp.eq.s32.totalorder %s176_s9, 0  ;;  %p190_p2 = scmp.eq.s32.totalorder %s1239_s28, 1 }
   0x7   : > { %p195_p3 = scmp.ne.s32.totalorder %s1164_s25, %s1160_s24  ;;  %p196_p4 = scmp.eq.s32.totalorder %s909_s29, 1 }
   0x8   : > { %s1254_s10 = scalar_select %p177_p1, %s1168_s26, %s179_s8  }
   0x9   : > { %p1256_p5 = por %p190_p2, %p189_p0  ;;  %p1260_p6 = por %p196_p4, %p195_p3 }
   0xa   : > { %p912_p7 = scmp.ge.s32.totalorder %s1172_s27, 1  ;;  %p241_p8 = scmp.lt.s32.totalorder %s1172_s27, 3 }
   0xc   : > { %p242_p9 = pnand %p912_p7, %p241_p8 }
   0xd   : > { %v1101_v0 = vld [vmem:[%s1422_s1] sm:$0x1f] (!%p242_p9)   ;;  %vm344_vm0 = vcmask (!%p242_p9), 1043456   ;;  %vm345_vm1 = vcmask (!%p242_p9), 1044480   ;;  %s914_s15 = sshll.u32 (!%p242_p9), %s1239_s28, 4  ;;  %v1174_v1 = vmov (!%p242_p9), 65535  }
   0xe   : > { %245 = sbr.rel (%p242_p9) target bundleno = 728 (0x2d8), region = 48  ;;  %v346_v2 = vsel (!%p242_p9), %vm344_vm0, 4294967295, %v1174_v1  ;;  %p274_p10 = scmp.lt.s32.totalorder (!%p242_p9), %s914_s15, 31  ;;  %v1102_v5 = vld [vmem:[%s1424_s3] sm:$0xff] (!%p242_p9)   ;;  %vm319_vm2 = vcmask (!%p242_p9), 72704   ;;  %v1103_v19 = vld [vmem:[%s1424_s3 + $0x8] sm:$0xff] (!%p242_p9)  }
   0xf   : > { %v347_v3 = vsel (!%p242_p9), %vm345_vm1, %v346_v2, 0  ;;  %v1104_v31 = vld [vmem:[%s1424_s3 + $0x10] sm:$0xff] (!%p242_p9)   ;;  %v1105_v32 = vld [vmem:[%s1424_s3 + $0x18] sm:$0xff] (!%p242_p9)   ;;  %v1106_v33 = vld [vmem:[%s1426_s5] sm:$0xff] (!%p242_p9)   ;;  %vm511_vm3 = vcmask (!%p242_p9), 523264   ;;  %s270_s9 = sand.u32 (!%p242_p9), 1, %s1164_s25  }
  0x10   : > { %v349_v4 = vand.u32 (!%p242_p9), %v1101_v0, %v347_v3  ;;  %v1107_v34 = vld [vmem:[%s1426_s5 + $0x8] sm:$0xff] (!%p242_p9)   ;;  %v916_v35 = vld [vmem:[%s1423_s2] ss:$0 sm:$0xff] (!%p242_p9)  ;;  %s913_s13 = sshll.u32 (!%p242_p9), %s270_s9, 7  ;;  %s957_s17 = sshll.u32 (!%p242_p9), %s1239_s28, 11 }
  0x11   : > { %s1351_s16 = scalar_lea.vmem (!%p242_p9), [#allocation2], %s913_s13  ;;  %s1380_s28 = scalar_lea.sflag (!%p242_p9), [#allocation3], %s270_s9 }
  0x12   : > { %991 = vmatprep.subr.bf16.mxu0 (!%p242_p9), %v349_v4  ;;  %1057 = vmatprep.subr.bf16.mxu1 (!%p242_p9), %v349_v4  ;;  %s1175_s23 = smov (!%p242_p9), [#allocation2]  }
  0x13   : > { %992 = vmatpush3.bf16.msra.mxu0 (!%p242_p9), %v349_v4  ;;  %1058 = vmatpush3.bf16.msra.mxu1 (!%p242_p9), %v349_v4  ;;  %s1114_s29 = sshll.u32 (!%p242_p9), %s1175_s23, 4  ;;  %s1115_s29 = int_to_ptr.vmem [resolvable:$false] %s1114_s29 }
  0x14   : > { %1009 = vmatprep.subr.bf16.mxu1 (!%p242_p9), %v1102_v5  ;;  %1033 = vmatprep.subr.bf16.mxu0 (!%p242_p9), %v1106_v33  ;;  %s1116_s8 = scalar_lea.vmem (!%p242_p9), %s1115_s29, 4096 }
  0x15   : > { %s1436_s15 = smov (!%p274_p10, %s914_s15), 31 }
  0x16   : > { %s915_s18 = sshll.u32 %s1436_s15, 3 }
  0x17   : > { %s1276_s21 = scalar_lea.vmem %s1421_s0, %s915_s18  ;;  %s847_s18 = sshll.u32 %s1351_s16, 4  ;;  %s1373_s18 = int_to_ptr.vmem [resolvable:$true] %s847_s18 }
  0x18   : > { %v281_v6 = vld [vmem:[%s1276_s21] sm:$0xff]  ;;  %v282_v7 = vld [vmem:[%s1276_s21 + $0x8] sm:$0xff]  ;;  %v283_v8 = vld [vmem:[%s1276_s21 + $0x10] sm:$0xff]  ;;  %s1110_s22 = scalar_lea.vmem %s1373_s18, 2048  ;;  %p1117_p0 = scmp.lt.s32.totalorder %s1373_s18, %s1115_s29 }
  0x19   : > { %v297_v9 = vpack.c.bf16 %v282_v7, %v281_v6  ;;  %v284_v10 = vld [vmem:[%s1276_s21 + $0x18] sm:$0xff]  ;;  %v285_v11 = vld [vmem:[%s1276_s21 + $0x20] sm:$0xff]  ;;  %v286_v12 = vld [vmem:[%s1276_s21 + $0x28] sm:$0xff]  ;;  %p1111_p11 = scmp.ne.s32.totalorder %s1373_s18, %s1110_s22  ;;  %p1118_p1 = scmp.lt.s32.totalorder %s1116_s8, %s1110_s22 }
  0x1a   : > { %v298_v13 = vpack.c.bf16 %v284_v10, %v283_v8  ;;  %v299_v14 = vpack.c.bf16 %v286_v12, %v285_v11  ;;  %v289_v15 = vld [vmem:[%s1276_s21 + $0x40] sm:$0xff]  ;;  %v290_v16 = vld [vmem:[%s1276_s21 + $0x48] sm:$0xff]  ;;  %v291_v17 = vld [vmem:[%s1276_s21 + $0x50] sm:$0xff] }
  0x1b   : > { %993 = vmatprep.mubr.msk.bf16.mxu0 %vm319_vm2, %v297_v9  ;;  %v292_v18 = vld [vmem:[%s1276_s21 + $0x58] sm:$0xff]  ;;  %v287_v20 = vld [vmem:[%s1276_s21 + $0x30] sm:$0xff]  ;;  %v301_v21 = vpack.c.bf16 %v290_v16, %v289_v15  ;;  %v293_v23 = vld [vmem:[%s1276_s21 + $0x60] sm:$0xff]  ;;  %p1112_p12 = pnand %p1111_p11, %p1256_p5  ;;  %p1119_p2 = por %p1118_p1, %p1117_p0 }
  0x1c   : > { %994 = vmatmul.mubr.msk.bf16.vlgmr.msra.gmra.mrb[0].mxu0 %vm319_vm2, %v298_v13  ;;  %v302_v22 = vpack.c.bf16 %v292_v18, %v291_v17  ;;  %v294_v24 = vld [vmem:[%s1276_s21 + $0x68] sm:$0xff]  ;;  %v288_v25 = vld [vmem:[%s1276_s21 + $0x38] sm:$0xff]  ;;  %v295_v28 = vld [vmem:[%s1276_s21 + $0x70] sm:$0xff] }
  0x1d   : > { %997 = vmatprep.mubr.msk.bf16.mxu0 %vm319_vm2, %v299_v14  ;;  %v303_v26 = vpack.c.bf16 %v294_v24, %v293_v23  ;;  %1001 = vmatprep.mubr.msk.bf16.mxu1 %vm319_vm2, %v301_v21  ;;  %v300_v27 = vpack.c.bf16 %v288_v25, %v287_v20  ;;  %v296_v29 = vld [vmem:[%s1276_s21 + $0x78] sm:$0xff]  ;;  %s1371_s21 = scalar_lea.hbm %s1428_s7, %s957_s17  ;;  %p1113_p13 = pneg %p1112_p12 }
  0x1e   : > { %1002 = vmatmul.mubr.msk.bf16.vlgmr.msra.gmra.mrb[0].mxu1 %vm319_vm2, %v302_v22  ;;  %v304_v30 = vpack.c.bf16 %v296_v29, %v295_v28  ;;  %1034 = vmatpush3.bf16.msra.mxu0 %v1106_v33  ;;  %v1108_v28 = vld [vmem:[%s1426_s5 + $0x10] sm:$0xff]   ;;  %v1109_v29 = vld [vmem:[%s1426_s5 + $0x18] sm:$0xff]  }
  0x1f   : > { %1005 = vmatprep.mubr.msk.bf16.mxu1 %vm319_vm2, %v303_v26  ;;  %1010 = vmatpush3.bf16.msra.mxu1 %v1102_v5  ;;  %p1120_p3 = pnand %p1119_p2, %p1113_p13 }
  0x20   : > { %1011 = vmatprep.subr.bf16.mxu1 %v1103_v19  ;;  %1035 = vmatprep.subr.bf16.mxu0 %v1107_v34 }
  0x22   : > { %1036 = vmatpush3.bf16.msra.mxu0 %v1107_v34 }
  0x23   : > { %1012 = vmatpush3.bf16.msra.mxu1 %v1103_v19  ;;  %1037 = vmatprep.subr.bf16.mxu0 %v1108_v28 }
  0x24   : > { %998 = vmatmul.mubr.msk.bf16.gmra.mrb[4].mxu0 %vm319_vm2, %v300_v27  ;;  %1013 = vmatprep.subr.bf16.mxu1 %v1104_v31 }
  0x26   : > { %1006 = vmatmul.mubr.msk.bf16.gmra.mrb[4].mxu1 %vm319_vm2, %v304_v30  ;;  %1038 = vmatpush3.bf16.msra.mxu0 %v1108_v28  ;;  %v926_v30 = vld [vmem:[%s1425_s4] ss:$0 sm:$0xff] }
  0x27   : > { %1014 = vmatpush3.bf16.msra.mxu1 %v1104_v31  ;;  %1039 = vmatprep.subr.bf16.mxu0 %v1109_v29 }
  0x28   : > { %1015 = vmatprep.subr.bf16.mxu1 %v1105_v32 }
  0x2a   : > { %1040 = vmatpush3.bf16.msra.mxu0 %v1109_v29 }
  0x2b   : > { %1016 = vmatpush3.bf16.msra.mxu1 %v1105_v32 }
  0xef   : > { %v995_v36 = vpop.f32.mrb[0].mxu0 }
  0xf0   : > { %v394_v37 = vadd.f32 %v995_v36, %v916_v35  ;;  %v385_v38 = vpop.f32.mrb[1].mxu0 }
  0xf1   : > { %v386_v39 = vadd.f32 %v916_v35, %v385_v38  ;;  %v996_v40 = vpop.f32.mrb[2].mxu0  ;;  %v1003_v43 = vpop.f32.mrb[0].mxu1 }
  0xf2   : > { %v397_v41 = vadd.f32 %v996_v40, %v916_v35  ;;  %v388_v42 = vpop.f32.mrb[3].mxu0  ;;  %v426_v45 = vadd.f32 %v1003_v43, %v916_v35  ;;  %v417_v46 = vpop.f32.mrb[1].mxu1  ;;  %v450_v47 = vmax.f32 %v394_v37, 0.0 }
  0xf3   : > { %v389_v44 = vadd.f32 %v916_v35, %v388_v42  ;;  %v418_v49 = vadd.f32 %v916_v35, %v417_v46  ;;  %v1004_v50 = vpop.f32.mrb[2].mxu1  ;;  %v448_v51 = vmax.f32 %v386_v39, 0.0 }
  0xf4   : > { %v451_v48 = vmax.f32 %v397_v41, 0.0  ;;  %v458_v53 = vmax.f32 %v426_v45, 0.0  ;;  %v429_v54 = vadd.f32 %v1004_v50, %v916_v35  ;;  %v420_v55 = vpop.f32.mrb[3].mxu1 }
  0xf5   : > { %v449_v52 = vmax.f32 %v389_v44, 0.0  ;;  %v456_v57 = vmax.f32 %v418_v49, 0.0  ;;  %v421_v58 = vadd.f32 %v916_v35, %v420_v55 }
  0xf6   : > { %v465_v56 = vpack.c.bf16 %v451_v48, %v450_v47  ;;  %v459_v61 = vmax.f32 %v429_v54, 0.0 }
  0xf7   : > { %v464_v59 = vpack.c.bf16 %v449_v52, %v448_v51  ;;  %v999_v60 = vpop.f32.mrb[4].mxu0  ;;  %v457_v0 = vmax.f32 %v421_v58, 0.0 }
  0xf8   : > { %v410_v62 = vadd.f32 %v999_v60, %v916_v35  ;;  %v401_v63 = vpop.f32.mrb[5].mxu0  ;;  %v469_v3 = vpack.c.bf16 %v459_v61, %v458_v53 }
  0xf9   : > { %v402_v1 = vadd.f32 %v916_v35, %v401_v63  ;;  %v1000_v2 = vpop.f32.mrb[6].mxu0  ;;  %1017 = vmatprep.mubr.msk.bf16.mxu1 %vm511_vm3, %v464_v59  ;;  %v468_v6 = vpack.c.bf16 %v457_v0, %v456_v57  ;;  %v1007_v7 = vpop.f32.mrb[4].mxu1 }
  0xfa   : > { %v413_v4 = vadd.f32 %v1000_v2, %v916_v35  ;;  %v404_v5 = vpop.f32.mrb[7].mxu0  ;;  %1018 = vmatmul.mubr.msk.bf16.vlgmr.msra.gmra.mrb[8].mxu1 %vm511_vm3, %v465_v56  ;;  %v442_v9 = vadd.f32 %v1007_v7, %v916_v35  ;;  %v433_v10 = vpop.f32.mrb[5].mxu1  ;;  %v454_v11 = vmax.f32 %v410_v62, 0.0 }
  0xfb   : > { %v405_v8 = vadd.f32 %v916_v35, %v404_v5  ;;  %v434_v13 = vadd.f32 %v916_v35, %v433_v10  ;;  %v1008_v14 = vpop.f32.mrb[6].mxu1  ;;  %v452_v15 = vmax.f32 %v402_v1, 0.0 }
  0xfc   : > { %v455_v12 = vmax.f32 %v413_v4, 0.0  ;;  %v462_v17 = vmax.f32 %v442_v9, 0.0  ;;  %v445_v18 = vadd.f32 %v1008_v14, %v916_v35  ;;  %v436_v19 = vpop.f32.mrb[7].mxu1 }
  0xfd   : > { %v453_v16 = vmax.f32 %v405_v8, 0.0  ;;  %v460_v21 = vmax.f32 %v434_v13, 0.0  ;;  %v437_v22 = vadd.f32 %v916_v35, %v436_v19 }
  0xfe   : > { %v467_v20 = vpack.c.bf16 %v455_v12, %v454_v11  ;;  %v463_v24 = vmax.f32 %v445_v18, 0.0 }
  0xff   : > { %v466_v23 = vpack.c.bf16 %v453_v16, %v452_v15  ;;  %v461_v25 = vmax.f32 %v437_v22, 0.0 }
 0x100   : > { %v471_v26 = vpack.c.bf16 %v463_v24, %v462_v17 }
 0x101   : > { %1021 = vmatprep.mubr.msk.bf16.mxu1 %vm511_vm3, %v466_v23  ;;  %v470_v27 = vpack.c.bf16 %v461_v25, %v460_v21  ;;  %v939_v23 = vld [vmem:[%s1427_s6] ss:$0 sm:$0xff] }
 0x102   : > { %1022 = vmatmul.mubr.msk.bf16.gmra.mrb[12].mxu1 %vm511_vm3, %v467_v20 }
 0x103   : > { %1025 = vmatprep.mubr.msk.bf16.mxu1 %vm511_vm3, %v468_v6 }
 0x10a   : > { %1026 = vmatmul.mubr.msk.bf16.gmra.mrb[16].mxu1 %vm511_vm3, %v469_v3 }
 0x10b   : > { %1029 = vmatprep.mubr.msk.bf16.mxu1 %vm511_vm3, %v470_v27 }
 0x112   : > { %1030 = vmatmul.mubr.msk.bf16.gmra.mrb[20].mxu1 %vm511_vm3, %v471_v26 }
 0x1cd   : > { %v1019_v31 = vpop.f32.mrb[8].mxu1 }
 0x1ce   : > { %v579_v32 = vadd.f32 %v1019_v31, %v926_v30  ;;  %v570_v33 = vpop.f32.mrb[9].mxu1 }
 0x1cf   : > { %v571_v34 = vadd.f32 %v926_v30, %v570_v33  ;;  %v1020_v35 = vpop.f32.mrb[10].mxu1 }
 0x1d0   : > { %v582_v36 = vadd.f32 %v1020_v35, %v926_v30  ;;  %v573_v37 = vpop.f32.mrb[11].mxu1  ;;  %v635_v39 = vmax.f32 %v579_v32, 0.0 }
 0x1d1   : > { %v574_v38 = vadd.f32 %v926_v30, %v573_v37  ;;  %v633_v41 = vmax.f32 %v571_v34, 0.0 }
 0x1d2   : > { %v636_v40 = vmax.f32 %v582_v36, 0.0 }
 0x1d3   : > { %v634_v42 = vmax.f32 %v574_v38, 0.0 }
 0x1d4   : > { %v650_v43 = vpack.c.bf16 %v636_v40, %v635_v39 }
 0x1d5   : > { %v649_v44 = vpack.c.bf16 %v634_v42, %v633_v41  ;;  %v1023_v45 = vpop.f32.mrb[12].mxu1 }
 0x1d6   : > { %v595_v46 = vadd.f32 %v1023_v45, %v926_v30  ;;  %v586_v47 = vpop.f32.mrb[13].mxu1 }
 0x1d7   : > { %v587_v48 = vadd.f32 %v926_v30, %v586_v47  ;;  %v1024_v49 = vpop.f32.mrb[14].mxu1  ;;  %1041 = vmatprep.mubr.msk.bf16.mxu0 %vm511_vm3, %v649_v44 }
 0x1d8   : > { %v598_v50 = vadd.f32 %v1024_v49, %v926_v30  ;;  %v589_v51 = vpop.f32.mrb[15].mxu1  ;;  %1042 = vmatmul.mubr.msk.bf16.vlgmr.msra.gmra.mrb[8].mxu0 %vm511_vm3, %v650_v43  ;;  %v639_v53 = vmax.f32 %v595_v46, 0.0 }
 0x1d9   : > { %v590_v52 = vadd.f32 %v926_v30, %v589_v51  ;;  %v637_v55 = vmax.f32 %v587_v48, 0.0 }
 0x1da   : > { %v640_v54 = vmax.f32 %v598_v50, 0.0 }
 0x1db   : > { %v638_v56 = vmax.f32 %v590_v52, 0.0 }
 0x1dc   : > { %v652_v57 = vpack.c.bf16 %v640_v54, %v639_v53 }
 0x1dd   : > { %v651_v58 = vpack.c.bf16 %v638_v56, %v637_v55  ;;  %v1027_v59 = vpop.f32.mrb[16].mxu1 }
 0x1de   : > { %v611_v60 = vadd.f32 %v1027_v59, %v926_v30  ;;  %v602_v61 = vpop.f32.mrb[17].mxu1 }
 0x1df   : > { %v603_v62 = vadd.f32 %v926_v30, %v602_v61  ;;  %v1028_v63 = vpop.f32.mrb[18].mxu1  ;;  %1045 = vmatprep.mubr.msk.bf16.mxu0 %vm511_vm3, %v651_v58 }
 0x1e0   : > { %v614_v0 = vadd.f32 %v1028_v63, %v926_v30  ;;  %v605_v1 = vpop.f32.mrb[19].mxu1  ;;  %1046 = vmatmul.mubr.msk.bf16.gmra.mrb[12].mxu0 %vm511_vm3, %v652_v57  ;;  %v643_v3 = vmax.f32 %v611_v60, 0.0 }
 0x1e1   : > { %v606_v2 = vadd.f32 %v926_v30, %v605_v1  ;;  %v641_v5 = vmax.f32 %v603_v62, 0.0 }
 0x1e2   : > { %v644_v4 = vmax.f32 %v614_v0, 0.0 }
 0x1e3   : > { %v642_v6 = vmax.f32 %v606_v2, 0.0 }
 0x1e4   : > { %v654_v7 = vpack.c.bf16 %v644_v4, %v643_v3 }
 0x1e5   : > { %v653_v8 = vpack.c.bf16 %v642_v6, %v641_v5  ;;  %v1031_v9 = vpop.f32.mrb[20].mxu1 }
 0x1e6   : > { %v627_v10 = vadd.f32 %v1031_v9, %v926_v30  ;;  %v618_v11 = vpop.f32.mrb[21].mxu1 }
 0x1e7   : > { %v619_v12 = vadd.f32 %v926_v30, %v618_v11  ;;  %v1032_v13 = vpop.f32.mrb[22].mxu1  ;;  %1049 = vmatprep.mubr.msk.bf16.mxu0 %vm511_vm3, %v653_v8 }
 0x1e8   : > { %v630_v14 = vadd.f32 %v1032_v13, %v926_v30  ;;  %v621_v15 = vpop.f32.mrb[23].mxu1  ;;  %1050 = vmatmul.mubr.msk.bf16.gmra.mrb[16].mxu0 %vm511_vm3, %v654_v7  ;;  %v647_v17 = vmax.f32 %v627_v10, 0.0 }
 0x1e9   : > { %v622_v16 = vadd.f32 %v926_v30, %v621_v15  ;;  %v645_v19 = vmax.f32 %v619_v12, 0.0 }
 0x1ea   : > { %v648_v18 = vmax.f32 %v630_v14, 0.0 }
 0x1eb   : > { %v646_v20 = vmax.f32 %v622_v16, 0.0 }
 0x1ec   : > { %v656_v21 = vpack.c.bf16 %v648_v18, %v647_v17 }
 0x1ed   : > { %v655_v22 = vpack.c.bf16 %v646_v20, %v645_v19 }
 0x1ef   : > { %1053 = vmatprep.mubr.msk.bf16.mxu0 %vm511_vm3, %v655_v22 }
 0x1f0   : > { %1054 = vmatmul.mubr.msk.bf16.gmra.mrb[20].mxu0 %vm511_vm3, %v656_v21 }
 0x2ab   : > { %v1043_v24 = vpop.f32.mrb[8].mxu0 }
 0x2ac   : > { %v763_v25 = vadd.f32 %v1043_v24, %v939_v23  ;;  %v754_v26 = vpop.f32.mrb[9].mxu0 }
 0x2ad   : > { %v755_v27 = vadd.f32 %v939_v23, %v754_v26  ;;  %v1044_v28 = vpop.f32.mrb[10].mxu0 }
 0x2ae   : > { %819 = vst [vmem:[%s1351_s16 + $0x10] sm:$0xff] %v763_v25  ;;  %v766_v29 = vadd.f32 %v1044_v28, %v939_v23  ;;  %v757_v30 = vpop.f32.mrb[11].mxu0 }
 0x2af   : > { %817 = vst [vmem:[%s1351_s16] sm:$0xff] %v755_v27  ;;  %v758_v31 = vadd.f32 %v939_v23, %v757_v30 }
 0x2b0   : > { %820 = vst [vmem:[%s1351_s16 + $0x18] sm:$0xff] %v766_v29 }
 0x2b1   : > { %818 = vst [vmem:[%s1351_s16 + $0x8] sm:$0xff] %v758_v31 }
 0x2b3   : > { %v1047_v32 = vpop.f32.mrb[12].mxu0 }
 0x2b4   : > { %v779_v33 = vadd.f32 %v1047_v32, %v939_v23  ;;  %v770_v34 = vpop.f32.mrb[13].mxu0 }
 0x2b5   : > { %v771_v35 = vadd.f32 %v939_v23, %v770_v34  ;;  %v1048_v36 = vpop.f32.mrb[14].mxu0 }
 0x2b6   : > { %823 = vst [vmem:[%s1351_s16 + $0x30] sm:$0xff] %v779_v33  ;;  %v782_v37 = vadd.f32 %v1048_v36, %v939_v23  ;;  %v773_v38 = vpop.f32.mrb[15].mxu0 }
 0x2b7   : > { %821 = vst [vmem:[%s1351_s16 + $0x20] sm:$0xff] %v771_v35  ;;  %v774_v39 = vadd.f32 %v939_v23, %v773_v38 }
 0x2b8   : > { %824 = vst [vmem:[%s1351_s16 + $0x38] sm:$0xff] %v782_v37 }
 0x2b9   : > { %822 = vst [vmem:[%s1351_s16 + $0x28] sm:$0xff] %v774_v39 }
 0x2bb   : > { %v1051_v40 = vpop.f32.mrb[16].mxu0 }
 0x2bc   : > { %v795_v41 = vadd.f32 %v1051_v40, %v939_v23  ;;  %v786_v42 = vpop.f32.mrb[17].mxu0 }
 0x2bd   : > { %v787_v43 = vadd.f32 %v939_v23, %v786_v42  ;;  %v1052_v44 = vpop.f32.mrb[18].mxu0 }
 0x2be   : > { %827 = vst [vmem:[%s1351_s16 + $0x50] sm:$0xff] %v795_v41  ;;  %v798_v45 = vadd.f32 %v1052_v44, %v939_v23  ;;  %v789_v46 = vpop.f32.mrb[19].mxu0 }
 0x2bf   : > { %825 = vst [vmem:[%s1351_s16 + $0x40] sm:$0xff] %v787_v43  ;;  %v790_v47 = vadd.f32 %v939_v23, %v789_v46 }
 0x2c0   : > { %828 = vst [vmem:[%s1351_s16 + $0x58] sm:$0xff] %v798_v45 }
 0x2c1   : > { %826 = vst [vmem:[%s1351_s16 + $0x48] sm:$0xff] %v790_v47 }
 0x2c3   : > { %v1055_v48 = vpop.f32.mrb[20].mxu0 }
 0x2c4   : > { %v811_v49 = vadd.f32 %v1055_v48, %v939_v23  ;;  %v802_v50 = vpop.f32.mrb[21].mxu0 }
 0x2c5   : > { %v803_v51 = vadd.f32 %v939_v23, %v802_v50  ;;  %v1056_v52 = vpop.f32.mrb[22].mxu0 }
 0x2c6   : > { %831 = vst [vmem:[%s1351_s16 + $0x70] sm:$0xff] %v811_v49  ;;  %v814_v53 = vadd.f32 %v1056_v52, %v939_v23  ;;  %v805_v54 = vpop.f32.mrb[23].mxu0 }
 0x2c7   : > { %829 = vst [vmem:[%s1351_s16 + $0x60] sm:$0xff] %v803_v51  ;;  %v806_v55 = vadd.f32 %v939_v23, %v805_v54 }
 0x2c8   : > { %832 = vst [vmem:[%s1351_s16 + $0x78] sm:$0xff] %v814_v53 }
 0x2c9   : > { %830 = vst [vmem:[%s1351_s16 + $0x68] sm:$0xff] %v806_v55 }
 0x2ca   : > { %1123 = shalt.err (!%p1120_p3)
}
 0x2cb   : > { %s1124_s9 = scalar_lea.hbm %s1371_s21, 2048  ;;  %s1128_s15 = scalar_lea.hbm %s1428_s7, 4096 }
 0x2cc   : > { %p1125_p4 = scmp.ne.s32.totalorder %s1371_s21, %s1124_s9  ;;  %p1129_p9 = scmp.lt.u32.totalorder %s1371_s21, %s1428_s7 }
 0x2cd   : > { %p1130_p10 = scmp.lt.u32.totalorder %s1128_s15, %s1124_s9  ;;  %p1132_p12 = scmp.lt.u32.totalorder %s1124_s9, %s1371_s21 }
 0x2ce   : > { %p1126_p7 = pnand %p1125_p4, %p1256_p5 }
 0x2cf   : > { %p1131_p11 = por %p1130_p10, %p1129_p9 }
 0x2d0   : > { %p1127_p8 = pneg %p1126_p7 }
 0x2d1   : > { %p1133_p13 = por %p1132_p12, %p1131_p11 }
 0x2d3   : > { %p1134_p0 = pnand %p1133_p13, %p1127_p8 }
 0x2d5   : > { %1137 = shalt.err (!%p1134_p0)
}
 0x2d6   : > { %s1176_s19 = smov 128   ;;  %s1177_s20 = smov 8  }
 0x2d7   : > { %1059 = dma.vmem_to_hbm [thread:$0]  (%p1256_p5), %s1373_s18, 2048, %s1371_s21, %s1380_s28, %s1176_s19, %s1176_s19, %s1177_s20  }
 0x2d8 PF: > { %p1065_p1 = scmp.ge.s32.totalorder %s1172_s27, 2  ;;  %s862_s22 = sand.u32 1, %s1160_s24  }
 0x2d9   : > { %s863_s23 = scalar_lea.sflag [#allocation3], %s862_s22 }
 0x2da   : > { %p1062_p2 = pnand %p1065_p1, %p1260_p6 }
 0x2dc   : > { %1155 = dma.done.wait (!%p1062_p2), %s863_s23, 2048  }
 0x2dd   : > { %1157 = vsyncadd (!%p1062_p2), %s863_s23, 4294965248  ;;  %p17_p3 = scmp.ge.s32.totalorder %s1243_s30, 4   ;;  %s1431_s24 = smov %s1164_s25 }
 0x2de   : > { %s1432_s25 = smov %s1168_s26  ;;  %s1433_s26 = smov %s1254_s10 }
 0x2df   : > { %s1434_s27 = smov %s1243_s30  ;;  %19 = sbr.rel (!%p17_p3) target bundleno = 3 (0x3), region = 83 }
 0x2e6   :  { %868 = vsyncpa [#allocation3], 1 }
 0x2e7   :  { %870 = vsyncpa [#allocation3 + $0x1], 1 }

</bundles_post_ra>
